<compile_context>
chip_gen: v7x
topology: tpu7x:2x2x1
jax: 0.10.0
libtpu: 0.0.40
codegen_flags: <defaults>
</compile_context>

<pallas_src>
import functools

import jax
import jax.numpy as jnp
from jax.experimental import pallas as pl
from jax.experimental.pallas import tpu as pltpu


def _self_attention_kernel(x_ref, w_ref, b_ref, o_ref, *, n_heads, use_bf16):
    # x_ref : (Bt, s, e)   block of batch elements
    # w_ref : (e, 3e)      fused [Wq | Wk | Wv], VMEM-resident across the grid
    # b_ref : (1, 3e)      fused bias (kept 2-D; one broadcast add)
    # o_ref : (Bt, s, e)   output, already in the module's final layout
    bt, s, e = x_ref.shape
    hd = e // n_heads

    mxu_dtype = jnp.bfloat16 if use_bf16 else jnp.float32

    x2d = x_ref[...].reshape(bt * s, e).astype(mxu_dtype)
    w = w_ref[...].astype(mxu_dtype)
    b = b_ref[...].astype(jnp.float32)            # 2-D bias

    # Single fused QKV projection on the MXU (f32 accumulation) + one bias add.
    qkv = jnp.dot(x2d, w, preferred_element_type=jnp.float32) + b   # (Bt*s, 3e)
    qkv = qkv.reshape(bt, s, 3 * e)

    # Static (unrolled) loop over heads; each head is an s x s attention
    # batched over Bt.  No 1/sqrt(hd) scaling, matching the reference module.
    head_outs = []
    for h in range(n_heads):
        q = qkv[:, :, h * hd:(h + 1) * hd]                           # (Bt, s, hd)
        k = qkv[:, :, e + h * hd:e + (h + 1) * hd]                   # (Bt, s, hd)
        v = qkv[:, :, 2 * e + h * hd:2 * e + (h + 1) * hd]           # (Bt, s, hd)

        scores = jnp.einsum("bqd,bkd->bqk", q, k,
                            preferred_element_type=jnp.float32)      # (Bt, s, s)

        # Numerically stable softmax, all in f32.
        mmax = jnp.max(scores, axis=-1, keepdims=True)
        p = jnp.exp(scores - mmax)
        denom = jnp.sum(p, axis=-1, keepdims=True)
        # Exact reciprocal keeps the 1e-5 verification tolerance; switch to
        # approx=True (EUP slot) if tolerance is relaxed.
        attn = p * pl.reciprocal(denom, approx=False)                # (Bt, s, s)

        out_h = jnp.einsum("bqk,bkd->bqd",
                           attn.astype(mxu_dtype), v.astype(mxu_dtype),
                           preferred_element_type=jnp.float32)       # (Bt, s, hd)
        head_outs.append(out_h)

    # One full-width lane-dense store per grid step (avoids H masked partial
    # stores of width hd < 128 lanes).
    o_ref[...] = jnp.concatenate(head_outs, axis=-1).astype(o_ref.dtype)


def self_attention_pallas(x, params, n_heads, *, block_m=None, use_bf16=False):
    """x: (m, s, e) float32.  params hold PyTorch nn.Linear-layout weights
    (W: (e_out, e_in), b: (e_out,)).  Returns (m, s, e)."""
    m, s, e = x.shape
    assert e % n_heads == 0

    # Fused, lane-dense QKV weight (e, 3e) and 2-D bias (1, 3e).
    w_qkv = jnp.concatenate(
        [params["wq"].T, params["wk"].T, params["wv"].T], axis=1)
    b_qkv = jnp.concatenate(
        [params["bq"], params["bk"], params["bv"]])[None, :]

    # Batch block: try to give the MXU >=128 LHS rows per step, but keep at
    # least 2 grid steps (when m >= 2) so both v7x TensorCores get work.
    if block_m is None:
        block_m = max(1, min(m, 128 // max(s, 1)))
        if m >= 2:
            block_m = min(block_m, (m + 1) // 2)
    while m % block_m:
        block_m -= 1
    grid = (m // block_m,)

    kernel = functools.partial(
        _self_attention_kernel, n_heads=n_heads, use_bf16=use_bf16)

    # TODO(synk): for long sequences on v7x (64 MiB VMEM) tile the KV axis
    # with an online-softmax accumulator instead of the full (s, s) scores.
    return pl.pallas_call(
        kernel,
        out_shape=jax.ShapeDtypeStruct((m, s, e), x.dtype),
        grid_spec=pltpu.PrefetchScalarGridSpec(
            num_scalar_prefetch=0,
            grid=grid,
            in_specs=[
                pl.BlockSpec((block_m, s, e), lambda i: (i, 0, 0)),
                # Constant index maps -> weights/bias DMA'd once, stay resident.
                pl.BlockSpec((e, 3 * e), lambda i: (0, 0)),
                pl.BlockSpec((1, 3 * e), lambda i: (0, 0)),
            ],
            out_specs=pl.BlockSpec((block_m, s, e), lambda i: (i, 0, 0)),
        ),
        compiler_params=pltpu.CompilerParams(
            dimension_semantics=("parallel",)),
    )(x, w_qkv, b_qkv)


def _reference_jax(x, params, n_heads):
    """Plain-JAX re-implementation of the PyTorch forward for verification."""
    m, s, e = x.shape
    hd = e // n_heads
    q = x @ params["wq"].T + params["bq"]
    k = x @ params["wk"].T + params["bk"]
    v = x @ params["wv"].T + params["bv"]
    q = q.reshape(m, s, n_heads, hd).transpose(0, 2, 1, 3).reshape(-1, s, hd)
    k = k.reshape(m, s, n_heads, hd).transpose(0, 2, 1, 3).reshape(-1, s, hd)
    v = v.reshape(m, s, n_heads, hd).transpose(0, 2, 1, 3).reshape(-1, s, hd)
    scores = jnp.einsum("bqd,bkd->bqk", q, k)
    attn = jax.nn.softmax(scores, axis=-1)
    o = jnp.einsum("bqk,bkd->bqd", attn, v)
    o = o.reshape(m, n_heads, s, hd).transpose(0, 2, 1, 3).reshape(m, s, e)
    return o


if __name__ == "__main__":
    # Small shapes consistent with the module: batch=2, seq=8, embed=32, heads=4.
    m, s, e, n_heads = 2, 8, 32, 4

    key = jax.random.PRNGKey(0)
    kx, kq, kbq, kk, kbk, kv, kbv = jax.random.split(key, 7)

    x = jax.random.normal(kx, (m, s, e), dtype=jnp.float32)

    # Deterministic nn.Linear-style init: U(-1/sqrt(in), 1/sqrt(in)).
    bound = 1.0 / jnp.sqrt(jnp.float32(e))
    params = {
        "wq": jax.random.uniform(kq,  (e, e), jnp.float32, -bound, bound),
        "bq": jax.random.uniform(kbq, (e,),   jnp.float32, -bound, bound),
        "wk": jax.random.uniform(kk,  (e, e), jnp.float32, -bound, bound),
        "bk": jax.random.uniform(kbk, (e,),   jnp.float32, -bound, bound),
        "wv": jax.random.uniform(kv,  (e, e), jnp.float32, -bound, bound),
        "bv": jax.random.uniform(kbv, (e,),   jnp.float32, -bound, bound),
    }

    out = self_attention_pallas(x, params, n_heads)
    out = jax.block_until_ready(out)

    ref = _reference_jax(x, params, n_heads)
    assert out.shape == (m, s, e)
    assert jnp.allclose(out, ref, atol=1e-5, rtol=1e-5), "mismatch vs reference"

    print("KERNEL_OK")
</pallas_src>

<mosaic_0001>
module attributes {stable_mosaic.version = 11 : i64} {
  func.func @_self_attention_kernel(%arg0: i32, %arg1: memref<1x8x32xf32, #tpu.memory_space<vmem>>, %arg2: memref<32x96xf32, #tpu.memory_space<vmem>>, %arg3: memref<1x96xf32, #tpu.memory_space<vmem>>, %arg4: memref<1x8x32xf32, #tpu.memory_space<vmem>>) attributes {dimension_semantics = [#tpu.dimension_semantics<parallel>], iteration_bounds = array<i64: 2>, scalar_prefetch = 0 : i64, scratch_operands = 0 : i64, tpu.core_type = #tpu.core_type<tc>, window_params = [{transform_indices = @transform_0, window_bounds = array<i64: 1, 8, 32>}, {pipeline_mode = #tpu.pipeline_mode<synchronous>, transform_indices = @transform_1, window_bounds = array<i64: 32, 96>}, {pipeline_mode = #tpu.pipeline_mode<synchronous>, transform_indices = @transform_2, window_bounds = array<i64: 1, 96>}, {transform_indices = @transform_3, window_bounds = array<i64: 1, 8, 32>}]} {
    %c0 = arith.constant 0 : index
    %c0_0 = arith.constant 0 : index
    %c0_1 = arith.constant 0 : index
    %0 = vector.load %arg1[%c0, %c0_0, %c0_1] : memref<1x8x32xf32, #tpu.memory_space<vmem>>, vector<1x8x32xf32>
    %1 = vector.shape_cast %0 : vector<1x8x32xf32> to vector<8x32xf32>
    %c0_2 = arith.constant 0 : index
    %c0_3 = arith.constant 0 : index
    %2 = vector.load %arg2[%c0_2, %c0_3] : memref<32x96xf32, #tpu.memory_space<vmem>>, vector<32x96xf32>
    %c0_4 = arith.constant 0 : index
    %c0_5 = arith.constant 0 : index
    %3 = vector.load %arg3[%c0_4, %c0_5] : memref<1x96xf32, #tpu.memory_space<vmem>>, vector<1x96xf32>
    %cst = arith.constant dense<0.000000e+00> : vector<8x96xf32>
    %4 = tpu.matmul %1, %2, %cst {dimension_numbers = #tpu.dot_dimension_numbers<[1], [0], [0], [1], [0, 0, 1, 1], [], []>} : vector<8x32xf32>, vector<32x96xf32>, vector<8x96xf32> -> vector<8x96xf32>
    %5 = vector.broadcast %3 : vector<1x96xf32> to vector<8x96xf32>
    %6 = arith.addf %4, %5 : vector<8x96xf32>
    %7 = vector.shape_cast %6 : vector<8x96xf32> to vector<1x8x96xf32>
    %8 = vector.extract_strided_slice %7 {offsets = [0, 0, 0], sizes = [1, 8, 8], strides = [1, 1, 1]} : vector<1x8x96xf32> to vector<1x8x8xf32>
    %9 = vector.extract_strided_slice %7 {offsets = [0, 0, 32], sizes = [1, 8, 8], strides = [1, 1, 1]} : vector<1x8x96xf32> to vector<1x8x8xf32>
    %10 = vector.extract_strided_slice %7 {offsets = [0, 0, 64], sizes = [1, 8, 8], strides = [1, 1, 1]} : vector<1x8x96xf32> to vector<1x8x8xf32>
    "tpu.trace_start"() <{level = 10 : i32, message = "bqd,bkd->bqk"}> : () -> ()
    %cst_6 = arith.constant dense<0.000000e+00> : vector<1x8x8xf32>
    %11 = tpu.matmul %8, %9, %cst_6 {dimension_numbers = #tpu.dot_dimension_numbers<[2], [2], [1], [1], [0, 0, 0, 1, 1, 1], [0], [0]>} : vector<1x8x8xf32>, vector<1x8x8xf32>, vector<1x8x8xf32> -> vector<1x8x8xf32>
    "tpu.trace_stop"() : () -> ()
    %cst_7 = arith.constant dense<0xFF800000> : vector<1x8xf32>
    %12 = vector.multi_reduction <maximumf>, %11, %cst_7 [2] : vector<1x8x8xf32> to vector<1x8xf32>
    %13 = vector.shape_cast %12 : vector<1x8xf32> to vector<1x8x1xf32>
    %14 = vector.broadcast %13 : vector<1x8x1xf32> to vector<1x8x8xf32>
    %15 = arith.subf %11, %14 : vector<1x8x8xf32>
    %16 = math.exp %15 : vector<1x8x8xf32>
    %cst_8 = arith.constant dense<0.000000e+00> : vector<1x8xf32>
    %17 = vector.multi_reduction <add>, %16, %cst_8 [2] : vector<1x8x8xf32> to vector<1x8xf32>
    %18 = vector.shape_cast %17 : vector<1x8xf32> to vector<1x8x1xf32>
    %19 = tpu.reciprocal %18 : vector<1x8x1xf32> -> vector<1x8x1xf32>
    %20 = vector.broadcast %19 : vector<1x8x1xf32> to vector<1x8x8xf32>
    %21 = arith.mulf %16, %20 : vector<1x8x8xf32>
    "tpu.trace_start"() <{level = 10 : i32, message = "bqk,bkd->bqd"}> : () -> ()
    %cst_9 = arith.constant dense<0.000000e+00> : vector<1x8x8xf32>
    %22 = tpu.matmul %21, %10, %cst_9 {dimension_numbers = #tpu.dot_dimension_numbers<[2], [1], [1], [2], [0, 0, 0, 1, 1, 2], [0], [0]>} : vector<1x8x8xf32>, vector<1x8x8xf32>, vector<1x8x8xf32> -> vector<1x8x8xf32>
    "tpu.trace_stop"() : () -> ()
    %23 = vector.extract_strided_slice %7 {offsets = [0, 0, 8], sizes = [1, 8, 8], strides = [1, 1, 1]} : vector<1x8x96xf32> to vector<1x8x8xf32>
    %24 = vector.extract_strided_slice %7 {offsets = [0, 0, 40], sizes = [1, 8, 8], strides = [1, 1, 1]} : vector<1x8x96xf32> to vector<1x8x8xf32>
    %25 = vector.extract_strided_slice %7 {offsets = [0, 0, 72], sizes = [1, 8, 8], strides = [1, 1, 1]} : vector<1x8x96xf32> to vector<1x8x8xf32>
    "tpu.trace_start"() <{level = 10 : i32, message = "bqd,bkd->bqk"}> : () -> ()
    %cst_10 = arith.constant dense<0.000000e+00> : vector<1x8x8xf32>
    %26 = tpu.matmul %23, %24, %cst_10 {dimension_numbers = #tpu.dot_dimension_numbers<[2], [2], [1], [1], [0, 0, 0, 1, 1, 1], [0], [0]>} : vector<1x8x8xf32>, vector<1x8x8xf32>, vector<1x8x8xf32> -> vector<1x8x8xf32>
    "tpu.trace_stop"() : () -> ()
    %cst_11 = arith.constant dense<0xFF800000> : vector<1x8xf32>
    %27 = vector.multi_reduction <maximumf>, %26, %cst_11 [2] : vector<1x8x8xf32> to vector<1x8xf32>
    %28 = vector.shape_cast %27 : vector<1x8xf32> to vector<1x8x1xf32>
    %29 = vector.broadcast %28 : vector<1x8x1xf32> to vector<1x8x8xf32>
    %30 = arith.subf %26, %29 : vector<1x8x8xf32>
    %31 = math.exp %30 : vector<1x8x8xf32>
    %cst_12 = arith.constant dense<0.000000e+00> : vector<1x8xf32>
    %32 = vector.multi_reduction <add>, %31, %cst_12 [2] : vector<1x8x8xf32> to vector<1x8xf32>
    %33 = vector.shape_cast %32 : vector<1x8xf32> to vector<1x8x1xf32>
    %34 = tpu.reciprocal %33 : vector<1x8x1xf32> -> vector<1x8x1xf32>
    %35 = vector.broadcast %34 : vector<1x8x1xf32> to vector<1x8x8xf32>
    %36 = arith.mulf %31, %35 : vector<1x8x8xf32>
    "tpu.trace_start"() <{level = 10 : i32, message = "bqk,bkd->bqd"}> : () -> ()
    %cst_13 = arith.constant dense<0.000000e+00> : vector<1x8x8xf32>
    %37 = tpu.matmul %36, %25, %cst_13 {dimension_numbers = #tpu.dot_dimension_numbers<[2], [1], [1], [2], [0, 0, 0, 1, 1, 2], [0], [0]>} : vector<1x8x8xf32>, vector<1x8x8xf32>, vector<1x8x8xf32> -> vector<1x8x8xf32>
    "tpu.trace_stop"() : () -> ()
    %38 = vector.extract_strided_slice %7 {offsets = [0, 0, 16], sizes = [1, 8, 8], strides = [1, 1, 1]} : vector<1x8x96xf32> to vector<1x8x8xf32>
    %39 = vector.extract_strided_slice %7 {offsets = [0, 0, 48], sizes = [1, 8, 8], strides = [1, 1, 1]} : vector<1x8x96xf32> to vector<1x8x8xf32>
    %40 = vector.extract_strided_slice %7 {offsets = [0, 0, 80], sizes = [1, 8, 8], strides = [1, 1, 1]} : vector<1x8x96xf32> to vector<1x8x8xf32>
    "tpu.trace_start"() <{level = 10 : i32, message = "bqd,bkd->bqk"}> : () -> ()
    %cst_14 = arith.constant dense<0.000000e+00> : vector<1x8x8xf32>
    %41 = tpu.matmul %38, %39, %cst_14 {dimension_numbers = #tpu.dot_dimension_numbers<[2], [2], [1], [1], [0, 0, 0, 1, 1, 1], [0], [0]>} : vector<1x8x8xf32>, vector<1x8x8xf32>, vector<1x8x8xf32> -> vector<1x8x8xf32>
    "tpu.trace_stop"() : () -> ()
    %cst_15 = arith.constant dense<0xFF800000> : vector<1x8xf32>
    %42 = vector.multi_reduction <maximumf>, %41, %cst_15 [2] : vector<1x8x8xf32> to vector<1x8xf32>
    %43 = vector.shape_cast %42 : vector<1x8xf32> to vector<1x8x1xf32>
    %44 = vector.broadcast %43 : vector<1x8x1xf32> to vector<1x8x8xf32>
    %45 = arith.subf %41, %44 : vector<1x8x8xf32>
    %46 = math.exp %45 : vector<1x8x8xf32>
    %cst_16 = arith.constant dense<0.000000e+00> : vector<1x8xf32>
    %47 = vector.multi_reduction <add>, %46, %cst_16 [2] : vector<1x8x8xf32> to vector<1x8xf32>
    %48 = vector.shape_cast %47 : vector<1x8xf32> to vector<1x8x1xf32>
    %49 = tpu.reciprocal %48 : vector<1x8x1xf32> -> vector<1x8x1xf32>
    %50 = vector.broadcast %49 : vector<1x8x1xf32> to vector<1x8x8xf32>
    %51 = arith.mulf %46, %50 : vector<1x8x8xf32>
    "tpu.trace_start"() <{level = 10 : i32, message = "bqk,bkd->bqd"}> : () -> ()
    %cst_17 = arith.constant dense<0.000000e+00> : vector<1x8x8xf32>
    %52 = tpu.matmul %51, %40, %cst_17 {dimension_numbers = #tpu.dot_dimension_numbers<[2], [1], [1], [2], [0, 0, 0, 1, 1, 2], [0], [0]>} : vector<1x8x8xf32>, vector<1x8x8xf32>, vector<1x8x8xf32> -> vector<1x8x8xf32>
    "tpu.trace_stop"() : () -> ()
    %53 = vector.extract_strided_slice %7 {offsets = [0, 0, 24], sizes = [1, 8, 8], strides = [1, 1, 1]} : vector<1x8x96xf32> to vector<1x8x8xf32>
    %54 = vector.extract_strided_slice %7 {offsets = [0, 0, 56], sizes = [1, 8, 8], strides = [1, 1, 1]} : vector<1x8x96xf32> to vector<1x8x8xf32>
    %55 = vector.extract_strided_slice %7 {offsets = [0, 0, 88], sizes = [1, 8, 8], strides = [1, 1, 1]} : vector<1x8x96xf32> to vector<1x8x8xf32>
    "tpu.trace_start"() <{level = 10 : i32, message = "bqd,bkd->bqk"}> : () -> ()
    %cst_18 = arith.constant dense<0.000000e+00> : vector<1x8x8xf32>
    %56 = tpu.matmul %53, %54, %cst_18 {dimension_numbers = #tpu.dot_dimension_numbers<[2], [2], [1], [1], [0, 0, 0, 1, 1, 1], [0], [0]>} : vector<1x8x8xf32>, vector<1x8x8xf32>, vector<1x8x8xf32> -> vector<1x8x8xf32>
    "tpu.trace_stop"() : () -> ()
    %cst_19 = arith.constant dense<0xFF800000> : vector<1x8xf32>
    %57 = vector.multi_reduction <maximumf>, %56, %cst_19 [2] : vector<1x8x8xf32> to vector<1x8xf32>
    %58 = vector.shape_cast %57 : vector<1x8xf32> to vector<1x8x1xf32>
    %59 = vector.broadcast %58 : vector<1x8x1xf32> to vector<1x8x8xf32>
    %60 = arith.subf %56, %59 : vector<1x8x8xf32>
    %61 = math.exp %60 : vector<1x8x8xf32>
    %cst_20 = arith.constant dense<0.000000e+00> : vector<1x8xf32>
    %62 = vector.multi_reduction <add>, %61, %cst_20 [2] : vector<1x8x8xf32> to vector<1x8xf32>
    %63 = vector.shape_cast %62 : vector<1x8xf32> to vector<1x8x1xf32>
    %64 = tpu.reciprocal %63 : vector<1x8x1xf32> -> vector<1x8x1xf32>
    %65 = vector.broadcast %64 : vector<1x8x1xf32> to vector<1x8x8xf32>
    %66 = arith.mulf %61, %65 : vector<1x8x8xf32>
    "tpu.trace_start"() <{level = 10 : i32, message = "bqk,bkd->bqd"}> : () -> ()
    %cst_21 = arith.constant dense<0.000000e+00> : vector<1x8x8xf32>
    %67 = tpu.matmul %66, %55, %cst_21 {dimension_numbers = #tpu.dot_dimension_numbers<[2], [1], [1], [2], [0, 0, 0, 1, 1, 2], [0], [0]>} : vector<1x8x8xf32>, vector<1x8x8xf32>, vector<1x8x8xf32> -> vector<1x8x8xf32>
    "tpu.trace_stop"() : () -> ()
    %68 = tpu.concatenate %22, %37, %52, %67 in 2 : vector<1x8x8xf32>, vector<1x8x8xf32>, vector<1x8x8xf32>, vector<1x8x8xf32> -> vector<1x8x32xf32>
    %c0_22 = arith.constant 0 : index
    %c0_23 = arith.constant 0 : index
    %c0_24 = arith.constant 0 : index
    %69 = vector.load %arg4[%c0_22, %c0_23, %c0_24] : memref<1x8x32xf32, #tpu.memory_space<vmem>>, vector<1x8x32xf32>
    tpu.vector_store %arg4[%c0_22, %c0_23, %c0_24], %68 {strides = array<i32>} : memref<1x8x32xf32, #tpu.memory_space<vmem>>, vector<1x8x32xf32>,
    return
  }
  func.func @transform_0(%arg0: i32) -> (i32, i32, i32) {
    %c0_i32 = arith.constant 0 : i32
    %c0_i32_0 = arith.constant 0 : i32
    %c0_i32_1 = arith.constant 0 : i32
    return %arg0, %c0_i32, %c0_i32_0 : i32, i32, i32
  }
  func.func @transform_1(%arg0: i32) -> (i32, i32) {
    %c0_i32 = arith.constant 0 : i32
    %c0_i32_0 = arith.constant 0 : i32
    %c0_i32_1 = arith.constant 0 : i32
    return %c0_i32, %c0_i32_0 : i32, i32
  }
  func.func @transform_2(%arg0: i32) -> (i32, i32) {
    %c0_i32 = arith.constant 0 : i32
    %c0_i32_0 = arith.constant 0 : i32
    %c0_i32_1 = arith.constant 0 : i32
    return %c0_i32, %c0_i32_0 : i32, i32
  }
  func.func @transform_3(%arg0: i32) -> (i32, i32, i32) {
    %c0_i32 = arith.constant 0 : i32
    %c0_i32_0 = arith.constant 0 : i32
    %c0_i32_1 = arith.constant 0 : i32
    return %arg0, %c0_i32, %c0_i32_0 : i32, i32, i32
  }
}

</mosaic_0001>

<bundles_post_ra>
// kernel: tpu_custom_call.1
= control target key start
LH: loop header
LB: loop body
LE: loop exit
PB: predicated region body
PF: predicated region fallthrough
CT: control target
= control target key end

     0   :  { %8 = vsyncpa [#allocation3], 0  ;;  %s1695_s0 = inlined_call_operand.hbm [shape: f32[2,8,32], index: 0, kind: input, shape index: {}]   ;;  %s1696_s1 = inlined_call_operand.hbm [shape: f32[32,96], index: 1, kind: input, shape index: {}]   ;;  %s1697_s2 = inlined_call_operand.vmem [shape: f32[1,96], index: 2, kind: input, shape index: {}]   ;;  %s1698_s3 = inlined_call_operand.hbm [shape: f32[2,8,32], index: 3, kind: output, shape index: {}]  }
   0x1   :  { %10 = vsyncpa [#allocation3 + $0x1], 0 }
   0x2   :  { %11 = vsyncpa [#allocation6], 0 }
   0x3   :  { %12 = vsyncpa [#allocation4], 0 }
   0x4   :  { %14 = vsyncpa [#allocation4 + $0x1], 0  ;;  %s1429_s12 = smov 0   ;;  %s1431_s13 = smov 0  }
   0x5   :  { %s1433_s14 = smov 0   ;;  %s1435_s15 = smov 0  }
   0x6 LB: > { %s1450_s16 = sadd.s32 4294967295, %s1385_s15   ;;  %s1059_s17 = sadd.s32 4294967294, %s1385_s15   ;;  %s1385_s15 = sphi %s1435_s15, %s1718_s15   ;;  %s1381_s14 = sphi %s1433_s14, %s1717_s14   ;;  %s1377_s13 = sphi %s1431_s13, %s1716_s13   ;;  %s1373_s12 = sphi %s1429_s12, %s1715_s12  }
   0x7   : > { %p40_p0 = scmp.ne.s32.totalorder %s1377_s13, %s1373_s12  ;;  %p1699_p1 = scmp.eq.s32.totalorder %s1450_s16, 0 }
   0x8   : > { %p112_p3 = scmp.eq.s32.totalorder %s1059_s17, 1  ;;  %p1060_p5 = scmp.ge.s32.totalorder %s1385_s15, 1 }
   0x9   : > { %p1459_p4 = por %p1699_p1, %p40_p0  ;;  %p119_p7 = scmp.lt.s32.totalorder %s1385_s15, 3 }
   0xa   : > { %p1464_p6 = por %p112_p3, %p40_p0  ;;  %s1387_s21 = smov [#allocation5]  }
   0xb   : > { %s1702_s18 = scalar_select %p1459_p4, 1, 0 }
   0xc   : > { %s1703_s19 = scalar_select %p1464_p6, 1, 0 }
   0xd   : > { %p1469_p8 = pnand %p1060_p5, %p119_p7  ;;  %s131_s22 = sshll.u32 %s1387_s21, 4  ;;  %s1473_s22 = int_to_ptr.vmem [resolvable:$true] %s131_s22 }
   0xe   : > { %s1485_s24 = sadd.s32 1, %s1385_s15   ;;  %s27_s25 = sadd.s32 1, %s1381_s14 }
   0xf   : > { %s1704_s20 = scalar_select %p1469_p8, 1, 0 }
  0x10   : > { %p1173_p9 = pneg %p1469_p8  ;;  %s24_s26 = ssub.s32 %s1385_s15, %s1485_s24 }
  0x11   : > { %s1257_s29 = scalar_lea.hbm %s1696_s1, 512 }
  0x12   : > { %p1480_p11 = pnand %p1173_p9, %p1699_p1  ;;  %p1258_p12 = scmp.ne.s32.totalorder %s1696_s1, %s1257_s29 }
  0x13   : > { %p1264_p5 = scmp.lt.u32.totalorder %s1257_s29, %s1696_s1 }
  0x14   : > { %p1259_p13 = pneg %p1480_p11 }
  0x16   : > { %p1260_p0 = pnand %p1259_p13, %p1258_p12 }
  0x18   : > { %p1261_p3 = pneg %p1260_p0 }
  0x1a   : > { %p1266_p7 = pnand %p1264_p5, %p1261_p3 }
  0x1c   : > { %1269 = shalt.err (!%p1266_p7)
}
  0x1d   : > { %s1270_s7 = scalar_lea.vmem %s1473_s22, 512  ;;  %p1278_p2 = scmp.lt.s32.totalorder %s1473_s22, %s1473_s22 }
  0x1e   : > { %p1271_p9 = scmp.ne.s32.totalorder %s1473_s22, %s1270_s7  ;;  %p1279_p6 = scmp.lt.s32.totalorder %s1270_s7, %s1270_s7 }
  0x20   : > { %p1273_p10 = pnand %p1271_p9, %p1259_p13  ;;  %p1280_p4 = por %p1279_p6, %p1278_p2 }
  0x22   : > { %p1274_p1 = pneg %p1273_p10 }
  0x24   : > { %p1281_p8 = pnand %p1280_p4, %p1274_p1 }
  0x26   : > { %1284 = shalt.err (!%p1281_p8)
}
  0x27   : > { %s1388_s8 = smov 128   ;;  %s1389_s9 = smov 8  }
  0x28   : > { %1176 = dma.hbm_to_vmem [thread:$0]  (!%p1480_p11), %s1696_s1, 512, %s1473_s22, [#allocation6], %s1388_s8, %s1388_s8, %s1389_s9  }
  0x29   : > { %p25_p2 = scmp.eq.s32.totalorder %s24_s26, 0  ;;  %p34_p1 = scmp.ne.s32.totalorder %s1381_s14, %s1377_s13 }
  0x2a   : > { %p35_p4 = scmp.eq.s32.totalorder %s1385_s15, 0  ;;  %p1186_p6 = scmp.lt.s32.totalorder %s1385_s15, 2 }
  0x2b   : > { %s1516_s17 = scalar_select %p25_p2, %s1381_s14, %s27_s25  }
  0x2c   : > { %p36_p8 = por %p35_p4, %p34_p1  ;;  %p1706_p10 = scmp.eq.s32.totalorder %s1450_s16, 1 }
  0x2d   : > { %s148_s27 = sand.u32 1, %s1381_s14   ;;  %s1064_s28 = sshll.u32 %s1385_s15, 7 }
  0x2e   : > { %p1520_p12 = por %p1706_p10, %p34_p1  ;;  %s1063_s29 = sshll.u32 %s148_s27, 3 }
  0x2f   : > { %s1529_s4 = scalar_lea.hbm %s1695_s0, %s1064_s28  ;;  %s152_s22 = scalar_lea.vmem [#allocation2], %s1063_s29 }
  0x30   : > { %s159_s25 = sshll.u32 %s152_s22, 4  ;;  %p1531_p11 = pnand %p1186_p6, %p36_p8  ;;  %s1535_s25 = int_to_ptr.vmem [resolvable:$true] %s159_s25 }
  0x31   : > { %s149_s5 = scalar_lea.sflag [#allocation3], %s148_s27  ;;  %s1285_s6 = scalar_lea.hbm %s1529_s4, 128 }
  0x32   : > { %p1286_p13 = scmp.ne.s32.totalorder %s1529_s4, %s1285_s6  ;;  %p1287_p0 = pneg %p1531_p11 }
  0x33   : > { %s1290_s9 = scalar_lea.hbm %s1695_s0, 256  ;;  %p1291_p7 = scmp.lt.u32.totalorder %s1529_s4, %s1695_s0 }
  0x34   : > { %p1288_p3 = pnand %p1287_p0, %p1286_p13  ;;  %p1292_p9 = scmp.lt.u32.totalorder %s1290_s9, %s1285_s6 }
  0x35   : > { %p1294_p1 = scmp.lt.u32.totalorder %s1285_s6, %s1529_s4 }
  0x36   : > { %p1289_p5 = pneg %p1288_p3  ;;  %p1293_p2 = por %p1292_p9, %p1291_p7 }
  0x38   : > { %p1295_p4 = por %p1294_p1, %p1293_p2 }
  0x3a   : > { %p1296_p6 = pnand %p1295_p4, %p1289_p5 }
  0x3c   : > { %1299 = shalt.err (!%p1296_p6)
}
  0x3d   : > { %s1300_s27 = scalar_lea.vmem %s1535_s25, 128  ;;  %s1390_s28 = smov [#allocation2]  }
  0x3e   : > { %p1301_p8 = scmp.ne.s32.totalorder %s1535_s25, %s1300_s27  ;;  %s1305_s29 = sshll.u32 %s1390_s28, 4  ;;  %s1306_s29 = int_to_ptr.vmem [resolvable:$false] %s1305_s29 }
  0x3f   : > { %s1307_s23 = scalar_lea.vmem %s1306_s29, 256  ;;  %p1308_p3 = scmp.lt.s32.totalorder %s1535_s25, %s1306_s29 }
  0x40   : > { %p1303_p10 = pnand %p1301_p8, %p1287_p0  ;;  %p1309_p7 = scmp.lt.s32.totalorder %s1307_s23, %s1300_s27 }
  0x42   : > { %p1304_p13 = pneg %p1303_p10  ;;  %p1310_p9 = por %p1309_p7, %p1308_p3 }
  0x44   : > { %p1311_p2 = pnand %p1310_p9, %p1304_p13 }
  0x46   : > { %1314 = shalt.err (!%p1311_p2)
}
  0x47   : > { %1180 = dma.hbm_to_vmem [thread:$0]  (!%p1531_p11), %s1529_s4, 128, %s1535_s25, %s149_s5  }
  0x48   : > { %p1709_p5 = scmp.ne.s32.totalorder %s1704_s20, 0 }
  0x49   : > { %s1565_s30 = sand.u32 (!%p1709_p5), 1, %s1377_s13   ;;  %p1710_p0 = scmp.ne.s32.totalorder (!%p1709_p5), %s1702_s18, 0 }
  0x4a   : > { %168 = sbr.rel (%p1709_p5) target bundleno = 1352 (0x548), region = 32  ;;  %s1066_s22 = sshll.u32 (!%p1709_p5), %s1565_s30, 3 }
  0x4b   : > { %s171_s6 = scalar_lea.sflag (!%p1709_p5), [#allocation3], %s1565_s30  ;;  %s174_s7 = scalar_lea.vmem (!%p1709_p5), [#allocation2], %s1066_s22 }
  0x51   : > { %1360 = dma.done.wait (%p1710_p0), %s171_s6, 128  }
  0x52   : > { %1362 = vsyncadd (%p1710_p0), %s171_s6, 4294967168  ;;  %p1711_p11 = scmp.eq.s32.totalorder %s1450_s16, 0 }
  0x54   : > { %1364 = dma.done.wait (%p1711_p11), [#allocation6], 512   ;;  %p1712_p1 = pmov %p1711_p11 }
  0x55   : > { %v1391_v0 = vmov 0.0|0.0   ;;  %vm1392_vm0 = vmmov 0   ;;  %v1393_v1 = vmov 0.0   ;;  %v202_v2 = vld [vmem:[#allocation5] sm:$0xff]  ;;  %v203_v3 = vld [vmem:[#allocation5 + $0x8] sm:$0xff]  ;;  %v204_v4 = vld [vmem:[#allocation5 + $0x10] sm:$0xff] }
  0x56   : > { %1366 = vsyncadd (%p1712_p1), [#allocation6], 4294966784  ;;  %1159 = vmatprep.subr.bf16.mxu0 %v1391_v0  ;;  %1116 = vmatprep.mubr.msk.f32.mxu0 %vm1392_vm0, %v1393_v1  ;;  %v1160_v5 = vpack.c.bf16 %v203_v3, %v202_v2  ;;  %v205_v6 = vld [vmem:[#allocation5 + $0x18] sm:$0xff]  ;;  %vm213_vm1 = vcmask 261120   ;;  %v1069_v9 = vld [vmem:[%s1697_s2] ss:$0 sm:$0xff] }
  0x57   : > { %1119 = vmatprep.subr.mxu1 %v1393_v1  ;;  %1121 = vmatprep.mubr.msk.f32.mxu1 %vm1392_vm0, %v1393_v1  ;;  %v1163_v7 = vpack.c.bf16 %v205_v6, %v204_v4  ;;  %v201_v8 = vld [vmem:[%s174_s7] sm:$0xff]  ;;  %s1394_s4 = smov 120   ;;  %s1395_s25 = smov 96   ;;  %vm290_vm2 = vcmask 64512   ;;  %vm960_vm3 = vcmask 130048   ;;  %vm962_vm4 = vcmask 195584  }
  0x58   : > { %1161 = vmatpush3.bf16.msra.mxu0 %v1160_v5  ;;  %s1396_s26 = smov 80   ;;  %s1397_s5 = smov 88  }
  0x59   : > { %1162 = vmatprep.subr.bf16.mxu0 %v1391_v0  ;;  %s1398_s8 = smov 72   ;;  %s1399_s9 = smov 112  }
  0x5a   : > { %s1400_s10 = smov 104   ;;  %s1401_s11 = smov 56  }
  0x5b   : > { %s1402_s27 = smov 64   ;;  %s1403_s28 = smov 48  }
  0x5c   : > { %1164 = vmatpush3.bf16.msra.mxu0 %v1163_v7  ;;  %s1404_s29 = smov 40   ;;  %s1405_s23 = smov 8  }
  0x5d   : > { %1129 = vmatprep.subr.mxu0 %v1393_v1  ;;  %s1406_s6 = smov 16   ;;  %s1407_s7 = smov 24  }
  0x5e   : > { %s1084_s18 = sshll.u32 %s1450_s16, 7  ;;  %s200_s20 = scalar_lea.vmem [#allocation7], %s1066_s22 }
  0x5f   : > { %1117 = vmatmul.mubr.msk.f32.vlgmr.msra.gmra.mrb[0].mxu0 %vm213_vm1, %v201_v8  ;;  %s966_s16 = scalar_lea.sflag [#allocation4], %s1565_s30 }
  0x60   : > { %1131 = vmatprep.mubr.msk.f32.mxu0 %vm1392_vm0, %v1393_v1 }
 0x132   : > { %v283_v10 = vpop.f32.mrb[0].mxu0 }
 0x133   : > { %v1591_v11 = vadd.f32 %v1069_v9, %v283_v10  ;;  %v1118_v12 = vpop.f32.mrb[1].mxu0 }
 0x135   : > { %452 = vrot.lane.b32.xlu1 %v1591_v11, %s1394_s4  ;;  %288 = vrot.lane.b32.xlu0 %v1591_v11, %s1395_s25  ;;  %s979_s4 = sshll.u32 %s200_s20, 4  ;;  %s1652_s4 = int_to_ptr.vmem [resolvable:$true] %s979_s4 }
 0x136   : > { %s1315_s22 = scalar_lea.vmem %s1652_s4, 128 }
 0x137   : > { %p1316_p4 = scmp.ne.s32.totalorder %s1652_s4, %s1315_s22 }
 0x139   : > { %619 = vrot.lane.b32.xlu1 %v1591_v11, %s1396_s26  ;;  %454 = vrot.lane.b32.xlu0 %v1591_v11, %s1397_s5  ;;  %s1650_s5 = scalar_lea.hbm %s1698_s3, %s1084_s18  ;;  %p1317_p6 = pnand %p1316_p4, %p1520_p12 }
 0x13b   : > { %p1318_p8 = pneg %p1317_p6 }
 0x13d   : > { %784 = vrot.lane.b32.xlu1 %v1591_v11, %s1398_s8  ;;  %617 = vrot.lane.b32.xlu0 %v1591_v11, %s1399_s9  ;;  %s1408_s8 = smov [#allocation7]  }
 0x13e   : > { %s1319_s9 = sshll.u32 %s1408_s8, 4  ;;  %s1320_s9 = int_to_ptr.vmem [resolvable:$false] %s1319_s9 }
 0x13f   : > { %p1322_p10 = scmp.lt.s32.totalorder %s1652_s4, %s1320_s9 }
 0x141   : > { %782 = vrot.lane.b32.xlu0 %v1591_v11, %s1400_s10  ;;  %s1321_s10 = scalar_lea.vmem %s1320_s9, 256 }
 0x142   : > { %p1323_p13 = scmp.lt.s32.totalorder %s1321_s10, %s1315_s22 }
 0x144   : > { %p1324_p3 = por %p1323_p13, %p1322_p10 }
 0x146   : > { %p1325_p7 = pnand %p1324_p3, %p1318_p8 }
 0x1a7   : > { %v453_v13 = vpop.permute.xlu1 %452  ;;  %v289_v14 = vpop.permute.xlu0 %288 }
 0x1a8   : > { %1120 = vmatpush3.xpose.msk.msra.mxu1 %vm290_vm2, %v289_v14 }
 0x1a9   : > { %1124 = vmatprep.subr.mxu1 %v1393_v1 }
 0x1ab   : > { %1122 = vmatmul.mubr.msk.f32.vlgmr.msra.gmra.mrb[0].mxu1 %vm290_vm2, %v1591_v11  ;;  %v455_v15 = vpop.permute.xlu0 %454  ;;  %v620_v16 = vpop.permute.xlu1 %619 }
 0x1ac   : > { %1130 = vmatpush3.xpose.msk.msra.mxu0 %vm290_vm2, %v455_v15  ;;  %1126 = vmatprep.mubr.msk.f32.mxu1 %vm1392_vm0, %v1393_v1 }
 0x1ad   : > { %1139 = vmatprep.subr.mxu0 %v1393_v1 }
 0x1af   : > { %1132 = vmatmul.mubr.msk.f32.vlgmr.msra.gmra.mrb[2].mxu0 %vm290_vm2, %v453_v13  ;;  %v618_v17 = vpop.permute.xlu0 %617  ;;  %v785_v18 = vpop.permute.xlu1 %784 }
 0x1b0   : > { %1140 = vmatpush3.xpose.msk.msra.mxu0 %vm290_vm2, %v620_v16  ;;  %1141 = vmatprep.mubr.msk.f32.mxu0 %vm1392_vm0, %v1393_v1 }
 0x1b1   : > { %1149 = vmatprep.subr.mxu0 %v1393_v1 }
 0x1b3   : > { %1142 = vmatmul.mubr.msk.f32.vlgmr.msra.gmra.mrb[4].mxu0 %vm290_vm2, %v618_v17  ;;  %v783_v19 = vpop.permute.xlu0 %782 }
 0x1b4   : > { %1150 = vmatpush3.xpose.msk.msra.mxu0 %vm290_vm2, %v785_v18  ;;  %1151 = vmatprep.mubr.msk.f32.mxu0 %vm1392_vm0, %v1393_v1 }
 0x1b7   : > { %1152 = vmatmul.mubr.msk.f32.vlgmr.msra.gmra.mrb[6].mxu0 %vm290_vm2, %v783_v19 }
 0x27e   : > { %v361_v20 = vpop.f32.mrb[0].mxu1 }
 0x27f   : > { %v1123_v21 = vpop.f32.mrb[1].mxu1  ;;  %v365_v22 = vsel %vm290_vm2, %v361_v20, -inf }
 0x280   : > { %366 = vmax.xlane.f32.xlu1 %v365_v22 }
 0x282   : > { %v526_v23 = vpop.f32.mrb[2].mxu0 }
 0x283   : > { %v1133_v24 = vpop.f32.mrb[3].mxu0  ;;  %v530_v25 = vsel %vm290_vm2, %v526_v23, -inf }
 0x284   : > { %531 = vmax.xlane.f32.xlu0 %v530_v25 }
 0x286   : > { %v691_v26 = vpop.f32.mrb[4].mxu0 }
 0x287   : > { %v1143_v27 = vpop.f32.mrb[5].mxu0  ;;  %v695_v28 = vsel %vm290_vm2, %v691_v26, -inf }
 0x288   : > { %696 = vmax.xlane.f32.xlu0 %v695_v28 }
 0x28a   : > { %v856_v29 = vpop.f32.mrb[6].mxu0 }
 0x28b   : > { %v1153_v30 = vpop.f32.mrb[7].mxu0  ;;  %v860_v31 = vsel %vm290_vm2, %v856_v29, -inf }
 0x28c   : > { %861 = vmax.xlane.f32.xlu1 %v860_v31 }
 0x29d   : > { %541 = vrot.lane.b32.xlu1 %v1591_v11, %s1401_s11 }
 0x30d   : > { %v367_v32 = vpop.xlane.xlu1 %366 }
 0x30e   : > { %v368_v33 = vsub.f32 %v361_v20, %v367_v32 }
 0x310   : > { %v369_v34 = vmul.f32 1.442695, %v368_v33 }
 0x311   : > { %v532_v35 = vpop.xlane.xlu0 %531 }
 0x312   : > { %1241 = vpow2.f32 %v369_v34  ;;  %v533_v36 = vsub.f32 %v526_v23, %v532_v35 }
 0x314   : > { %v534_v37 = vmul.f32 1.442695, %v533_v36 }
 0x315   : > { %v697_v47 = vpop.xlane.xlu0 %696 }
 0x316   : > { %1243 = vpow2.f32 %v534_v37  ;;  %v698_v48 = vsub.f32 %v691_v26, %v697_v47 }
 0x318   : > { %v699_v49 = vmul.f32 1.442695, %v698_v48 }
 0x319   : > { %v862_v38 = vpop.xlane.xlu1 %861 }
 0x31a   : > { %v863_v39 = vsub.f32 %v856_v29, %v862_v38 }
 0x31c   : > { %v1242_v40 = vpop.eup %1241  ;;  %v864_v41 = vmul.f32 1.442695, %v863_v39 }
 0x31d   : > { %v371_v42 = vsel %vm290_vm2, %v1242_v40, 0.0  ;;  %v542_v52 = vpop.permute.xlu1 %541 }
 0x31e   : > { %1245 = vpow2.f32 %v864_v41  ;;  %372 = vadd.xlane.f32.xlu0 %v371_v42 }
 0x31f   : > { %1247 = vpow2.f32 %v699_v49 }
 0x320   : > { %v1244_v43 = vpop.eup %1243 }
 0x321   : > { %v536_v44 = vsel %vm290_vm2, %v1244_v43, 0.0 }
 0x322   : > { %537 = vadd.xlane.f32.xlu1 %v536_v44 }
 0x328   : > { %v1246_v45 = vpop.eup %1245 }
 0x329   : > { %v866_v46 = vsel %vm290_vm2, %v1246_v45, 0.0  ;;  %v1248_v50 = vpop.eup %1247 }
 0x32a   : > { %867 = vadd.xlane.f32.xlu1 %v866_v46  ;;  %v701_v51 = vsel %vm290_vm2, %v1248_v50, 0.0 }
 0x334   : > { %376 = vrot.lane.b32.xlu0 %v1591_v11, %s1402_s27 }
 0x33b   : > { %706 = vrot.lane.b32.xlu1 %v1591_v11, %s1403_s28 }
 0x353   : > { %702 = vadd.xlane.f32.xlu0 %v701_v51 }
 0x369   : > { %871 = vrot.lane.b32.xlu0 %v1591_v11, %s1404_s29 }
 0x3ab   : > { %v373_v53 = vpop.xlane.xlu0 %372 }
 0x3ac   : > { %1249 = vrcp.f32 %v373_v53 }
 0x3af   : > { %v377_v54 = vpop.permute.xlu0 %376  ;;  %v538_v55 = vpop.xlane.xlu1 %537 }
 0x3b0   : > { %1251 = vrcp.f32 %v538_v55  ;;  %1125 = vmatpush3.msra.mxu1 %v377_v54 }
 0x3b1   : > { %1134 = vmatprep.subr.mxu1 %v1393_v1 }
 0x3b6   : > { %v1250_v56 = vpop.eup %1249 }
 0x3b7   : > { %v375_v57 = vmul.f32 %v1250_v56, %v1242_v40  ;;  %v868_v58 = vpop.xlane.xlu1 %867 }
 0x3b9   : > { %1127 = vmatmul.mubr.msk.f32.vlgmr.msra.gmra.mrb[2].mxu1 %vm290_vm2, %v375_v57 }
 0x3ba   : > { %v1252_v59 = vpop.eup %1251  ;;  %1135 = vmatpush3.msra.mxu1 %v542_v52  ;;  %1136 = vmatprep.mubr.msk.f32.mxu1 %vm1392_vm0, %v1393_v1 }
 0x3bb   : > { %v540_v60 = vmul.f32 %v1252_v59, %v1244_v43  ;;  %v707_v61 = vpop.permute.xlu1 %706  ;;  %1144 = vmatprep.subr.mxu1 %v1393_v1 }
 0x3bd   : > { %1137 = vmatmul.mubr.msk.f32.vlgmr.msra.gmra.mrb[4].mxu1 %vm290_vm2, %v540_v60 }
 0x3be   : > { %1145 = vmatpush3.msra.mxu1 %v707_v61  ;;  %1146 = vmatprep.mubr.msk.f32.mxu1 %vm1392_vm0, %v1393_v1 }
 0x3bf   : > { %1154 = vmatprep.subr.mxu1 %v1393_v1 }
 0x3e0   : > { %v703_v62 = vpop.xlane.xlu0 %702 }
 0x3e1   : > { %1253 = vrcp.f32 %v703_v62 }
 0x3e2   : > { %1255 = vrcp.f32 %v868_v58 }
 0x3e4   : > { %v872_v3 = vpop.permute.xlu0 %871 }
 0x3eb   : > { %v1254_v63 = vpop.eup %1253 }
 0x3ec   : > { %v705_v0 = vmul.f32 %v1254_v63, %v1248_v50  ;;  %v1256_v2 = vpop.eup %1255 }
 0x3ed   : > { %v870_v4 = vmul.f32 %v1256_v2, %v1246_v45 }
 0x3ee   : > { %1147 = vmatmul.mubr.msk.f32.vlgmr.msra.gmra.mrb[6].mxu1 %vm290_vm2, %v705_v0 }
 0x3ef   : > { %1155 = vmatpush3.msra.mxu1 %v872_v3  ;;  %1156 = vmatprep.mubr.msk.f32.mxu1 %vm1392_vm0, %v1393_v1 }
 0x3f2   : > { %1157 = vmatmul.mubr.msk.f32.vlgmr.msra.gmra.mrb[8].mxu1 %vm290_vm2, %v870_v4 }
 0x48c   : > { %v448_v5 = vpop.f32.mrb[2].mxu1 }
 0x48d   : > { %v1128_v6 = vpop.f32.mrb[3].mxu1 }
 0x490   : > { %v613_v7 = vpop.f32.mrb[4].mxu1 }
 0x491   : > { %948 = vrot.lane.b32.xlu1 %v613_v7, %s1405_s23  ;;  %v1138_v8 = vpop.f32.mrb[5].mxu1 }
 0x4c1   : > { %v778_v9 = vpop.f32.mrb[6].mxu1 }
 0x4c2   : > { %952 = vrot.lane.b32.xlu0 %v778_v9, %s1406_s6  ;;  %v1148_v10 = vpop.f32.mrb[7].mxu1 }
 0x4c5   : > { %v943_v11 = vpop.f32.mrb[8].mxu1 }
 0x4c6   : > { %956 = vrot.lane.b32.xlu1 %v943_v11, %s1407_s7  ;;  %v1158_v1 = vpop.f32.mrb[9].mxu1 }
 0x503   : > { %v949_v12 = vpop.permute.xlu1 %948 }
 0x504   : > { %v959_v14 = vsel %vm290_vm2, %v448_v5, %v949_v12 }
 0x534   : > { %v953_v13 = vpop.permute.xlu0 %952 }
 0x535   : > { %v961_v15 = vsel %vm960_vm3, %v959_v14, %v953_v13 }
 0x538   : > { %v957_v16 = vpop.permute.xlu1 %956 }
 0x539   : > { %v963_v17 = vsel %vm962_vm4, %v961_v15, %v957_v16 }
 0x53a   : > { %964 = vst.msk [vmem:[%s200_s20] sm:$0xff] %vm213_vm1, %v963_v17 }
 0x53b   : > { %1328 = shalt.err (!%p1325_p7)
}
 0x53c   : > { %s1329_s30 = scalar_lea.hbm %s1650_s5, 128  ;;  %s1333_s28 = scalar_lea.hbm %s1698_s3, 256 }
 0x53d   : > { %p1330_p9 = scmp.ne.s32.totalorder %s1650_s5, %s1329_s30  ;;  %p1334_p0 = scmp.lt.u32.totalorder %s1650_s5, %s1698_s3 }
 0x53e   : > { %p1335_p11 = scmp.lt.u32.totalorder %s1333_s28, %s1329_s30  ;;  %p1337_p4 = scmp.lt.u32.totalorder %s1329_s30, %s1650_s5 }
 0x53f   : > { %p1331_p2 = pnand %p1330_p9, %p1520_p12 }
 0x540   : > { %p1336_p1 = por %p1335_p11, %p1334_p0 }
 0x541   : > { %p1332_p5 = pneg %p1331_p2 }
 0x542   : > { %p1338_p6 = por %p1337_p4, %p1336_p1 }
 0x544   : > { %p1339_p8 = pnand %p1338_p6, %p1332_p5 }
 0x546   : > { %1342 = shalt.err (!%p1339_p8)
}
 0x547   : > { %1171 = dma.vmem_to_hbm [thread:$0]  (%p1520_p12), %s1652_s4, 128, %s1650_s5, %s966_s16  }
 0x548 PF: > { %s991_s6 = sand.u32 1, %s1373_s12   ;;  %p1713_p10 = scmp.ne.s32.totalorder %s1703_s19, 0 }
 0x549   : > { %p1714_p13 = scmp.ge.s32.totalorder %s1385_s15, 2  ;;  %s992_s7 = scalar_lea.sflag [#allocation4], %s991_s6 }
 0x54b   : > { %p1182_p3 = pnand %p1714_p13, %p1713_p10 }
 0x54d   : > { %1368 = dma.done.wait (!%p1182_p3), %s992_s7, 128  }
 0x54e   : > { %1370 = vsyncadd (!%p1182_p3), %s992_s7, 4294967168  ;;  %p17_p7 = scmp.ge.s32.totalorder %s1485_s24, 4   ;;  %s1715_s12 = smov %s1377_s13 }
 0x54f   : > { %s1716_s13 = smov %s1381_s14  ;;  %s1717_s14 = smov %s1516_s17 }
 0x550   : > { %s1718_s15 = smov %s1485_s24  ;;  %19 = sbr.rel (!%p17_p7) target bundleno = 6 (0x6), region = 81 }
 0x557   :  { %997 = vsyncpa [#allocation3], 1 }
 0x558   :  { %999 = vsyncpa [#allocation3 + $0x1], 1 }
 0x559   :  { %1000 = vsyncpa [#allocation6], 1 }
 0x55a   :  { %1001 = vsyncpa [#allocation4], 1 }
 0x55b   :  { %1003 = vsyncpa [#allocation4 + $0x1], 1 }

</bundles_post_ra>
